<compile_context>
chip_gen: v7x
topology: tpu7x:2x2x1
jax: 0.10.0
libtpu: 0.0.40
codegen_flags: <defaults>
</compile_context>

<pallas_src>
import jax
import jax.numpy as jnp
from jax import lax
from jax.experimental import pallas as pl
from jax.experimental.pallas import tpu as pltpu


def _round_up(x, m):
    return ((x + m - 1) // m) * m


def _pick_tile_m(M, H, itemsize, *, tile_bytes_target=4 << 20,
                 x_budget_bytes=16 << 20):
    """Pick token-tile size tm, number of tiles, and padded M.

    The kernel is HBM-bandwidth bound on the x stream (M*H elements read, only
    C*M written), so tiles are sized by bytes: big enough to amortize the
    ~0.35us per-grid-step overhead, small enough that the double-buffered
    stream fits comfortably in scoped VMEM on v5e/v6e/v7x.
    """
    row_bytes = H * itemsize
    # Small inputs: one whole-array block. Block dims == array dims satisfies
    # the (8,128) rule trivially; no padding, no grid overhead.
    if M * row_bytes <= tile_bytes_target and M <= 4096:
        return M, 1, M
    # Multi-tile: tm must be a multiple of 128 so the (C, tm) output tile is
    # lane-dense and the (tm, H) input tile is sublane-aligned.
    tm = min(max(tile_bytes_target // row_bytes, 128), 8192)
    tm = max(128, (tm // 128) * 128)
    # Keep the double-buffered x stream inside the per-generation VMEM budget.
    while tm > 128 and 2 * tm * row_bytes > x_budget_bytes:
        tm = max(128, ((tm // 2) // 128) * 128)
    n_tiles = pl.cdiv(M, tm)
    return tm, n_tiles, tm * n_tiles


def _span_logits_kernel(x_ref, w_ref, b_ref, out_ref):
    # x_ref:   (tm, H)  token-row tile of the flattened [B*S, H] input
    # w_ref:   (C, H)   PyTorch nn.Linear weight layout (resident across grid)
    # b_ref:   (C, 1)   bias, broadcast over the token (lane) dimension
    # out_ref: (C, tm)  lane-dense logits tile
    logits = lax.dot_general(
        w_ref[...],
        x_ref[...],
        dimension_numbers=(((1,), (1,)), ((), ())),  # contract over H: w @ x.T
        preferred_element_type=jnp.float32,
    )
    out_ref[...] = (logits + b_ref[...]).astype(out_ref.dtype)


def span_extraction_forward(input_feature, weight, bias):
    """SpanExtractionModule.forward.

    input_feature: [B, S, H]; weight: [C, H] (PyTorch layout); bias: [C].
    Returns (start_logits, end_logits), each [B, S] (n_classes C >= 2).
    """
    B, S, H = input_feature.shape
    C = weight.shape[0]
    M = B * S
    itemsize = jnp.dtype(input_feature.dtype).itemsize

    x2d = input_feature.reshape(M, H)
    tm, n_tiles, m_pad = _pick_tile_m(M, H, itemsize)
    if m_pad != M:
        x2d = jnp.pad(x2d, ((0, m_pad - M), (0, 0)))
    b2d = bias.reshape(C, 1).astype(jnp.float32)

    # Scoped-VMEM request: double-buffered x tiles + (sublane-padded) output
    # tiles + resident weight/bias blocks, with 2x headroom; capped at 32 MiB
    # so it is safe on v7x (64 MiB physical) as well as v5e/v6e (128 MiB).
    vmem_needed = (
        2 * tm * H * itemsize                       # x tiles (double buffered)
        + 2 * 8 * _round_up(max(tm, 128), 128) * 4  # output tiles (f32)
        + 2 * 8 * _round_up(H, 128) * itemsize      # weight block
        + 2 * 8 * 128 * 4                           # bias block
    )
    vmem_limit = int(min(max(2 * vmem_needed, 16 << 20), 32 << 20))

    cost = pl.CostEstimate(
        flops=2 * m_pad * H * C,
        transcendentals=0,
        bytes_accessed=m_pad * H * itemsize + C * H * itemsize + C * m_pad * 4,
    )

    logits_t = pl.pallas_call(
        _span_logits_kernel,
        out_shape=jax.ShapeDtypeStruct((C, m_pad), jnp.float32),
        grid=(n_tiles,),
        in_specs=[
            pl.BlockSpec((tm, H), lambda i: (i, 0)),   # streamed token tiles
            pl.BlockSpec((C, H), lambda i: (0, 0)),    # weight, grid-invariant
            pl.BlockSpec((C, 1), lambda i: (0, 0)),    # bias, grid-invariant
        ],
        out_specs=pl.BlockSpec((C, tm), lambda i: (0, i)),  # lane-dense output
        compiler_params=pltpu.CompilerParams(
            dimension_semantics=("parallel",),
            vmem_limit_bytes=vmem_limit,
        ),
        cost_estimate=cost,
    )(x2d, weight, b2d)

    # split(1, dim=-1) + squeeze(-1)  ->  contiguous row slices of [C, M].
    start_logits = logits_t[0, :M].reshape(B, S)
    end_logits = logits_t[1, :M].reshape(B, S)
    return start_logits, end_logits


if __name__ == "__main__":
    # Config consistent with the module: hidden_size=32, n_classes=2,
    # initializer_range=0.02. Small shapes: batch=2, seq=8.
    B, S, H, C = 2, 8, 32, 2
    initializer_range = 0.02

    key = jax.random.PRNGKey(0)
    k_x, k_w, k_x2, k_w2 = jax.random.split(key, 4)

    input_feature = jax.random.normal(k_x, (B, S, H), dtype=jnp.float32)
    # nn.Linear weight is [n_classes, hidden_size], init N(0, 0.02); bias zeros.
    weight = initializer_range * jax.random.normal(k_w, (C, H), dtype=jnp.float32)
    bias = jnp.zeros((C,), dtype=jnp.float32)

    start_logits, end_logits = span_extraction_forward(input_feature, weight, bias)
    jax.block_until_ready((start_logits, end_logits))

    ref = input_feature @ weight.T + bias
    assert start_logits.shape == (B, S) and end_logits.shape == (B, S)
    assert jnp.allclose(start_logits, ref[..., 0], atol=1e-5)
    assert jnp.allclose(end_logits, ref[..., 1], atol=1e-5)

    # Exercise the multi-tile (grid > 1) + padded-M path at a moderate size.
    B2, S2, H2 = 2, 1000, 256
    x2 = jax.random.normal(k_x2, (B2, S2, H2), dtype=jnp.float32)
    w2 = initializer_range * jax.random.normal(k_w2, (C, H2), dtype=jnp.float32)
    b2 = 0.1 * jnp.arange(C, dtype=jnp.float32)
    s2, e2 = span_extraction_forward(x2, w2, b2)
    jax.block_until_ready((s2, e2))
    ref2 = x2 @ w2.T + b2
    assert jnp.allclose(s2, ref2[..., 0], atol=1e-4, rtol=1e-4)
    assert jnp.allclose(e2, ref2[..., 1], atol=1e-4, rtol=1e-4)

    print("KERNEL_OK")
</pallas_src>

<mosaic_0001>
module attributes {stable_mosaic.version = 11 : i64} {
  func.func @_span_logits_kernel(%arg0: i32, %arg1: memref<16x32xf32, #tpu.memory_space<vmem>>, %arg2: memref<2x32xf32, #tpu.memory_space<vmem>>, %arg3: memref<2x1xf32, #tpu.memory_space<vmem>>, %arg4: memref<2x16xf32, #tpu.memory_space<vmem>>) attributes {dimension_semantics = [#tpu.dimension_semantics<parallel>], iteration_bounds = array<i64: 1>, scalar_prefetch = 0 : i64, scratch_operands = 0 : i64, tpu.core_type = #tpu.core_type<tc>, window_params = [{transform_indices = @transform_0, window_bounds = array<i64: 16, 32>}, {pipeline_mode = #tpu.pipeline_mode<synchronous>, transform_indices = @transform_1, window_bounds = array<i64: 2, 32>}, {pipeline_mode = #tpu.pipeline_mode<synchronous>, transform_indices = @transform_2, window_bounds = array<i64: 2, 1>}, {transform_indices = @transform_3, window_bounds = array<i64: 2, 16>}]} {
    %c0 = arith.constant 0 : index
    %c0_0 = arith.constant 0 : index
    %0 = vector.load %arg2[%c0, %c0_0] : memref<2x32xf32, #tpu.memory_space<vmem>>, vector<2x32xf32>
    %c0_1 = arith.constant 0 : index
    %c0_2 = arith.constant 0 : index
    %1 = vector.load %arg1[%c0_1, %c0_2] : memref<16x32xf32, #tpu.memory_space<vmem>>, vector<16x32xf32>
    %cst = arith.constant dense<0.000000e+00> : vector<2x16xf32>
    %2 = tpu.matmul %0, %1, %cst {dimension_numbers = #tpu.dot_dimension_numbers<[1], [1], [0], [0], [0, 0, 1, 0], [], []>} : vector<2x32xf32>, vector<16x32xf32>, vector<2x16xf32> -> vector<2x16xf32>
    %c0_3 = arith.constant 0 : index
    %c0_4 = arith.constant 0 : index
    %3 = vector.load %arg3[%c0_3, %c0_4] : memref<2x1xf32, #tpu.memory_space<vmem>>, vector<2x1xf32>
    %4 = vector.broadcast %3 : vector<2x1xf32> to vector<2x16xf32>
    %5 = arith.addf %2, %4 : vector<2x16xf32>
    %c0_5 = arith.constant 0 : index
    %c0_6 = arith.constant 0 : index
    %6 = vector.load %arg4[%c0_5, %c0_6] : memref<2x16xf32, #tpu.memory_space<vmem>>, vector<2x16xf32>
    tpu.vector_store %arg4[%c0_5, %c0_6], %5 {strides = array<i32>} : memref<2x16xf32, #tpu.memory_space<vmem>>, vector<2x16xf32>,
    return
  }
  func.func @transform_0(%arg0: i32) -> (i32, i32) {
    %c0_i32 = arith.constant 0 : i32
    %c0_i32_0 = arith.constant 0 : i32
    return %arg0, %c0_i32 : i32, i32
  }
  func.func @transform_1(%arg0: i32) -> (i32, i32) {
    %c0_i32 = arith.constant 0 : i32
    %c0_i32_0 = arith.constant 0 : i32
    %c0_i32_1 = arith.constant 0 : i32
    return %c0_i32, %c0_i32_0 : i32, i32
  }
  func.func @transform_2(%arg0: i32) -> (i32, i32) {
    %c0_i32 = arith.constant 0 : i32
    %c0_i32_0 = arith.constant 0 : i32
    %c0_i32_1 = arith.constant 0 : i32
    return %c0_i32, %c0_i32_0 : i32, i32
  }
  func.func @transform_3(%arg0: i32) -> (i32, i32) {
    %c0_i32 = arith.constant 0 : i32
    %c0_i32_0 = arith.constant 0 : i32
    return %c0_i32, %arg0 : i32, i32
  }
}

</mosaic_0001>

<bundles_post_ra>
// kernel: tpu_custom_call.1
= control target key start
LH: loop header
LB: loop body
LE: loop exit
PB: predicated region body
PF: predicated region fallthrough
CT: control target
= control target key end

     0   :  { %8 = vsyncpa [#allocation3], 0  ;;  %s267_s0 = inlined_call_operand.hbm [shape: f32[16,32], index: 0, kind: input, shape index: {}]   ;;  %s268_s1 = inlined_call_operand.vmem [shape: f32[2,32], index: 1, kind: input, shape index: {}]   ;;  %s269_s2 = inlined_call_operand.vmem [shape: f32[2,1], index: 2, kind: input, shape index: {}]   ;;  %s270_s3 = inlined_call_operand.hbm [shape: f32[2,16], index: 3, kind: output, shape index: {}]  }
   0x1   :  { %9 = vsyncpa [#allocation4], 0  ;;  %s209_s12 = smov [#allocation2]   ;;  %s161_s16 = scalar_lea.hbm %s267_s0, 256 }
   0x2   :  { %s15_s13 = sshll.u32 %s209_s12, 4  ;;  %p162_p0 = scmp.ne.s32.totalorder %s267_s0, %s161_s16  ;;  %s16_s13 = int_to_ptr.vmem [resolvable:$true] %s15_s13 }
   0x3   :  { %p165_p1 = scmp.lt.u32.totalorder %s161_s16, %s267_s0 }
   0x5   :  { %p167_p2 = pnand %p165_p1, %p162_p0 }
   0x7   :  { %170 = shalt.err (!%p167_p2)
}
   0x8   :  { %s171_s21 = scalar_lea.vmem %s16_s13, 256  ;;  %p176_p4 = scmp.lt.s32.totalorder %s16_s13, %s16_s13 }
   0x9   :  { %p172_p3 = scmp.ne.s32.totalorder %s16_s13, %s171_s21  ;;  %p177_p5 = scmp.lt.s32.totalorder %s171_s21, %s171_s21 }
   0xb   :  { %p178_p6 = por %p177_p5, %p176_p4 }
   0xd   :  { %p179_p7 = pnand %p178_p6, %p172_p3 }
   0xf   :  { %182 = shalt.err (!%p179_p7)
}
  0x10   :  { %s210_s22 = smov 128   ;;  %s211_s23 = smov 8  }
  0x11   :  { %21 = dma.hbm_to_vmem [thread:$0]  %s267_s0, 256, %s16_s13, [#allocation3], %s210_s22, %s210_s22, %s211_s23  }
  0x12   :  { %205 = dma.done.wait [#allocation3], 256  }
  0x13   :  { %206 = vsyncadd [#allocation3], 4294967040  ;;  %v212_v0 = vmov 0.0|0.0   ;;  %vm213_vm0 = vmmov 0   ;;  %v214_v1 = vmov 0.0   ;;  %v215_v2 = vmov 0  }
  0x14   :  { %148 = vmatprep.subr.bf16.mxu0 %v212_v0  ;;  %145 = vmatprep.mubr.msk.f32.mxu0 %vm213_vm0, %v214_v1  ;;  %vm38_vm1 = vcmask 261120   ;;  %v30_v3 = vld [vmem:[#allocation2] sm:$0xff]  ;;  %v31_v4 = vld [vmem:[#allocation2 + $0x8] sm:$0xff]  ;;  %s216_s29 = smov [#allocation5]   ;;  %vm118_vm3 = vcmask 123904  }
  0x15   :  { %160 = vset.pattern.permute.xlu0 %v215_v2  ;;  %vm150_vm2 = vmpackc.low %vm38_vm1, %vm38_vm1  ;;  %v149_v5 = vpack.c.bf16 %v31_v4, %v30_v3  ;;  %v32_v6 = vld [vmem:[%s269_s2] sm:$0x3]  ;;  %s126_s30 = sshll.u32 %s216_s29, 4  ;;  %s127_s30 = int_to_ptr.vmem [resolvable:$true] %s126_s30 }
  0x16   :  { %35 = vperm.xlu0 %160, %v32_v6   ;;  %v29_v7 = vld [vmem:[%s268_s1] sm:$0x3]  ;;  %s183_s4 = scalar_lea.vmem %s127_s30, 32  ;;  %p188_p9 = scmp.lt.s32.totalorder %s127_s30, %s127_s30 }
  0x17   :  { %151 = vmatpush3.bf16.xpose.msk.msra.mxu0 %vm150_vm2, %v149_v5  ;;  %p184_p8 = scmp.ne.s32.totalorder %s127_s30, %s183_s4  ;;  %p189_p10 = scmp.lt.s32.totalorder %s183_s4, %s183_s4 }
  0x19   :  { %p190_p11 = por %p189_p10, %p188_p9 }
  0x1b   :  { %p191_p12 = pnand %p190_p11, %p184_p8 }
  0x1e   :  { %146 = vmatmul.mubr.msk.f32.vlgmr.msra.gmra.mrb[0].mxu0 %vm38_vm1, %v29_v7 }
  0x95   :  { %v36_v8 = vpop.permute.xlu0 %35 }
  0xf1   :  { %v114_v9 = vpop.f32.mrb[0].mxu0 }
  0xf2   :  { %v115_v10 = vadd.f32 %v114_v9, %v36_v8  ;;  %v147_v11 = vpop.f32.mrb[1].mxu0 }
  0xf4   :  { %119 = vst.msk [vmem:[#allocation5] sm:$0x3] %vm118_vm3, %v115_v10 }
  0xf5   :  { %194 = shalt.err (!%p191_p12)
}
  0xf6   :  { %s195_s1 = scalar_lea.hbm %s270_s3, 32 }
  0xf7   :  { %p196_p13 = scmp.ne.s32.totalorder %s270_s3, %s195_s1  ;;  %p199_p0 = scmp.lt.u32.totalorder %s195_s1, %s270_s3 }
  0xf9   :  { %p201_p1 = pnand %p199_p0, %p196_p13 }
  0xfb   :  { %204 = shalt.err (!%p201_p1)
}
  0xfc   :  { %129 = dma.vmem_to_hbm [thread:$0]  %s127_s30, 32, %s270_s3, [#allocation4]  }
  0xfd   :  { %207 = dma.done.wait [#allocation4], 32  }
  0xfe   :  { %208 = vsyncadd [#allocation4], 4294967264 }
  0xff   :  { %133 = vsyncpa [#allocation3], 1 }
 0x100   :  { %134 = vsyncpa [#allocation4], 1 }

</bundles_post_ra>
